<compile_context>
chip_gen: v6e
topology: v6e:2x2x1
jax: 0.10.0
libtpu: 0.0.40
codegen_flags: <defaults>
</compile_context>

<pallas_src>
import functools

import jax
import jax.numpy as jnp
from jax.experimental import pallas as pl
from jax.experimental.pallas import tpu as pltpu

_LANES = 128
_TARGET_BLOCK_BYTES = 4 * 1024 * 1024   # per input block (x2 inputs x2 bufs = 16 MiB)
_VMEM_LIMIT_BYTES = 32 * 1024 * 1024    # raises v5e's 16 MiB default; fits v7x's 64 MiB


def _round_up(x, m):
    return ((x + m - 1) // m) * m


def _chip_ncores():
    """Outer 'parallel' grid extent: 1 on single-TensorCore chips, else 2."""
    try:
        kind = jax.devices()[0].device_kind.lower().replace(" ", "")
        if ("v5e" in kind or "v5lite" in kind
                or "v6e" in kind or "v6lite" in kind):
            return 1
    except Exception:
        pass
    return 2


def _charbonnier_sum_kernel(x_ref, y_ref, o_ref, acc_ref, *,
                            valid_rows, blk, inner, eps):
    """Accumulate sum(sqrt((x - y)^2 + eps)) into an (8,128) partial-sum slab."""
    c = pl.program_id(0)   # parallel ("core") axis
    i = pl.program_id(1)   # sequential reduction axis

    @pl.when(i == 0)
    def _init():
        acc_ref[...] = jnp.zeros_like(acc_ref)

    x = x_ref[...].astype(jnp.float32)
    y = y_ref[...].astype(jnp.float32)
    diff = x - y
    err = jnp.sqrt(diff * diff + jnp.float32(eps))

    logical_block = c * inner + i
    row0 = logical_block * blk
    full_block = row0 + blk <= valid_rows

    @pl.when(full_block)
    def _accumulate_full():
        # Hot path: pure cross-vreg VALU adds, no masking, no cross-lane work.
        acc_ref[...] += err.reshape(blk // 8, 8, _LANES).sum(axis=0)

    @pl.when(jnp.logical_not(full_block))
    def _accumulate_tail():
        # Only the (at most one per core) ragged / out-of-range block pays for
        # the row mask.  Keep the select (it does not propagate NaN from any
        # garbage rows of a partial DMA); do NOT turn it into multiply-by-mask.
        row_idx = row0 + jax.lax.broadcasted_iota(jnp.int32, err.shape, 0)
        masked = jnp.where(row_idx < valid_rows, err, 0.0)
        acc_ref[...] += masked.reshape(blk // 8, 8, _LANES).sum(axis=0)

    @pl.when(i == inner - 1)
    def _finalize():
        # One lane-dense store of this core's (8,128) partial-sum slab; the
        # final cross-lane/sublane reduction happens once, in the wrapper.
        o_ref[...] = acc_ref[...]


def l1_charbonnier_loss(X, Y, eps=1e-06):
    """Pallas equivalent of L1_Charbonnier_loss().forward(X, Y)."""
    assert X.shape == Y.shape, "X and Y must have the same shape"
    n = X.size
    xf = jnp.ravel(X)
    yf = jnp.ravel(Y)

    rows = n // _LANES
    n_bulk = rows * _LANES

    # Ragged tail (< 128 elements): handled in plain JAX so the kernel never
    # needs padded HBM copies of the inputs.
    if n_bulk != n:
        xt = xf[n_bulk:].astype(jnp.float32)
        yt = yf[n_bulk:].astype(jnp.float32)
        dt = xt - yt
        tail_sum = jnp.sum(jnp.sqrt(dt * dt + jnp.float32(eps)))
        xf = xf[:n_bulk]
        yf = yf[:n_bulk]
    else:
        tail_sum = jnp.float32(0.0)

    if rows == 0:
        return tail_sum / jnp.float32(n)

    # Lane-dense 2-D view; reshape of the flat array is a layout no-op.
    # Native dtype is kept: upcast to f32 happens inside the kernel.
    x2 = xf.reshape(rows, _LANES)
    y2 = yf.reshape(rows, _LANES)

    itemsize = jnp.dtype(x2.dtype).itemsize
    # Packed sublane multiple: 8 for f32, 16 for bf16, 32 for int8/fp8.
    sublane_mult = 8 * max(1, 4 // itemsize)
    max_block_rows = _round_up(
        max(sublane_mult, _TARGET_BLOCK_BYTES // (_LANES * itemsize)),
        sublane_mult)
    blk = min(max_block_rows, _round_up(rows, sublane_mult))
    total_blocks = pl.cdiv(rows, blk)
    ncores = _chip_ncores()
    if total_blocks < ncores:
        ncores = 1
    inner = pl.cdiv(total_blocks, ncores)

    def in_index(c, i):
        # Clamp so a DMA never starts fully outside the array; the kernel
        # masks out any logically out-of-range rows.
        b = jnp.minimum(c * inner + i, total_blocks - 1)
        return (b, 0)

    kernel = functools.partial(
        _charbonnier_sum_kernel,
        valid_rows=rows, blk=blk, inner=inner, eps=float(eps))

    cost = pl.CostEstimate(
        flops=4 * n_bulk,
        transcendentals=n_bulk,
        bytes_accessed=2 * n_bulk * itemsize + ncores * 8 * _LANES * 4)

    out = pl.pallas_call(
        kernel,
        out_shape=jax.ShapeDtypeStruct((ncores * 8, _LANES), jnp.float32),
        grid=(ncores, inner),
        in_specs=[
            pl.BlockSpec((blk, _LANES), in_index),
            pl.BlockSpec((blk, _LANES), in_index),
        ],
        out_specs=pl.BlockSpec((8, _LANES), lambda c, i: (c, 0)),
        scratch_shapes=[pltpu.VMEM((8, _LANES), jnp.float32)],
        compiler_params=pltpu.CompilerParams(
            dimension_semantics=("parallel", "arbitrary"),
            vmem_limit_bytes=_VMEM_LIMIT_BYTES),
        cost_estimate=cost,
    )(x2, y2)

    bulk_sum = jnp.sum(out)   # one (8,128) partial-sum slab per core
    return (bulk_sum + tail_sum) / jnp.float32(n)


if __name__ == "__main__":
    key = jax.random.PRNGKey(0)
    kx, ky = jax.random.split(key)
    shape = (2, 4, 16, 16)  # NCHW, as the PyTorch module expects
    X = jax.random.normal(kx, shape, dtype=jnp.float32)
    Y = jax.random.normal(ky, shape, dtype=jnp.float32)

    loss = l1_charbonnier_loss(X, Y)
    loss = jax.block_until_ready(loss)

    # Reference check in plain JAX (matches the PyTorch module: eps not squared).
    diff = X - Y
    ref = jnp.mean(jnp.sqrt(diff * diff + 1e-06))
    assert jnp.allclose(loss, ref, rtol=1e-5, atol=1e-6), (loss, ref)

    print("KERNEL_OK")
</pallas_src>

<mosaic_0001>
module attributes {stable_mosaic.version = 11 : i64} {
  func.func @_charbonnier_sum_kernel(%arg0: i32, %arg1: i32, %arg2: memref<16x128xf32, #tpu.memory_space<vmem>>, %arg3: memref<16x128xf32, #tpu.memory_space<vmem>>, %arg4: memref<8x128xf32, #tpu.memory_space<vmem>>, %arg5: memref<8x128xf32, #tpu.memory_space<vmem>>) attributes {dimension_semantics = [#tpu.dimension_semantics<parallel>, #tpu.dimension_semantics<arbitrary>], iteration_bounds = array<i64: 1, 1>, scalar_prefetch = 0 : i64, scratch_operands = 1 : i64, tpu.core_type = #tpu.core_type<tc>, window_params = [{transform_indices = @transform_0, window_bounds = array<i64: 16, 128>}, {transform_indices = @transform_1, window_bounds = array<i64: 16, 128>}, {transform_indices = @transform_2, window_bounds = array<i64: 8, 128>}]} {
    %c0_i32 = arith.constant 0 : i32
    %0 = arith.cmpi eq, %arg1, %c0_i32 : i32
    %1 = arith.extui %0 : i1 to i32
    %c0_i32_0 = arith.constant 0 : i32
    %2 = arith.cmpi ne, %1, %c0_i32_0 : i32
    scf.if %2 {
      %cst_10 = arith.constant 0.000000e+00 : f32
      %23 = vector.broadcast %cst_10 : f32 to vector<8x128xf32>
      %c0_11 = arith.constant 0 : index
      %c0_12 = arith.constant 0 : index
      %24 = vector.load %arg5[%c0_11, %c0_12] : memref<8x128xf32, #tpu.memory_space<vmem>>, vector<8x128xf32>
      tpu.vector_store %arg5[%c0_11, %c0_12], %23 {strides = array<i32>} : memref<8x128xf32, #tpu.memory_space<vmem>>, vector<8x128xf32>,
    } else {
    }
    %c0 = arith.constant 0 : index
    %c0_1 = arith.constant 0 : index
    %3 = vector.load %arg2[%c0, %c0_1] : memref<16x128xf32, #tpu.memory_space<vmem>>, vector<16x128xf32>
    %c0_2 = arith.constant 0 : index
    %c0_3 = arith.constant 0 : index
    %4 = vector.load %arg3[%c0_2, %c0_3] : memref<16x128xf32, #tpu.memory_space<vmem>>, vector<16x128xf32>
    %5 = arith.subf %3, %4 : vector<16x128xf32>
    %6 = arith.mulf %5, %5 : vector<16x128xf32>
    %cst = arith.constant 9.99999997E-7 : f32
    %7 = vector.broadcast %cst : f32 to vector<16x128xf32>
    %8 = arith.addf %6, %7 : vector<16x128xf32>
    %9 = math.sqrt %8 : vector<16x128xf32>
    %c1_i32 = arith.constant 1 : i32
    %10 = arith.muli %arg0, %c1_i32 : i32
    %11 = arith.addi %10, %arg1 : i32
    %c16_i32 = arith.constant 16 : i32
    %12 = arith.muli %11, %c16_i32 : i32
    %c16_i32_4 = arith.constant 16 : i32
    %13 = arith.addi %12, %c16_i32_4 : i32
    %c16_i32_5 = arith.constant 16 : i32
    %14 = arith.cmpi sle, %13, %c16_i32_5 : i32
    %15 = arith.extui %14 : i1 to i32
    %c0_i32_6 = arith.constant 0 : i32
    %16 = arith.cmpi ne, %15, %c0_i32_6 : i32
    scf.if %16 {
      %c0_10 = arith.constant 0 : index
      %c0_11 = arith.constant 0 : index
      %23 = vector.load %arg5[%c0_10, %c0_11] : memref<8x128xf32, #tpu.memory_space<vmem>>, vector<8x128xf32>
      %24 = vector.shape_cast %9 : vector<16x128xf32> to vector<2x8x128xf32>
      %cst_12 = arith.constant dense<0.000000e+00> : vector<8x128xf32>
      %25 = vector.multi_reduction <add>, %24, %cst_12 [0] : vector<2x8x128xf32> to vector<8x128xf32>
      %26 = arith.addf %23, %25 : vector<8x128xf32>
      %c0_13 = arith.constant 0 : index
      %c0_14 = arith.constant 0 : index
      %27 = vector.load %arg5[%c0_13, %c0_14] : memref<8x128xf32, #tpu.memory_space<vmem>>, vector<8x128xf32>
      tpu.vector_store %arg5[%c0_13, %c0_14], %26 {strides = array<i32>} : memref<8x128xf32, #tpu.memory_space<vmem>>, vector<8x128xf32>,
    } else {
    }
    %true = arith.constant true
    %17 = arith.xori %14, %true : i1
    %18 = arith.extui %17 : i1 to i32
    %c0_i32_7 = arith.constant 0 : i32
    %19 = arith.cmpi ne, %18, %c0_i32_7 : i32
    scf.if %19 {
      %23 = tpu.iota {dimensions = array<i32: 0>} : vector<16x128xi32>
      %24 = vector.broadcast %12 : i32 to vector<16x128xi32>
      %25 = arith.addi %24, %23 : vector<16x128xi32>
      %c16_i32_10 = arith.constant 16 : i32
      %26 = vector.broadcast %c16_i32_10 : i32 to vector<16x128xi32>
      %27 = arith.cmpi slt, %25, %26 : vector<16x128xi32>
      %cst_11 = arith.constant 0.000000e+00 : f32
      %28 = vector.broadcast %cst_11 : f32 to vector<16x128xf32>
      %29 = arith.select %27, %9, %28 : vector<16x128xi1>, vector<16x128xf32>
      %c0_12 = arith.constant 0 : index
      %c0_13 = arith.constant 0 : index
      %30 = vector.load %arg5[%c0_12, %c0_13] : memref<8x128xf32, #tpu.memory_space<vmem>>, vector<8x128xf32>
      %31 = vector.shape_cast %29 : vector<16x128xf32> to vector<2x8x128xf32>
      %cst_14 = arith.constant dense<0.000000e+00> : vector<8x128xf32>
      %32 = vector.multi_reduction <add>, %31, %cst_14 [0] : vector<2x8x128xf32> to vector<8x128xf32>
      %33 = arith.addf %30, %32 : vector<8x128xf32>
      %c0_15 = arith.constant 0 : index
      %c0_16 = arith.constant 0 : index
      %34 = vector.load %arg5[%c0_15, %c0_16] : memref<8x128xf32, #tpu.memory_space<vmem>>, vector<8x128xf32>
      tpu.vector_store %arg5[%c0_15, %c0_16], %33 {strides = array<i32>} : memref<8x128xf32, #tpu.memory_space<vmem>>, vector<8x128xf32>,
    } else {
    }
    %c0_i32_8 = arith.constant 0 : i32
    %20 = arith.cmpi eq, %arg1, %c0_i32_8 : i32
    %21 = arith.extui %20 : i1 to i32
    %c0_i32_9 = arith.constant 0 : i32
    %22 = arith.cmpi ne, %21, %c0_i32_9 : i32
    scf.if %22 {
      %c0_10 = arith.constant 0 : index
      %c0_11 = arith.constant 0 : index
      %23 = vector.load %arg5[%c0_10, %c0_11] : memref<8x128xf32, #tpu.memory_space<vmem>>, vector<8x128xf32>
      %c0_12 = arith.constant 0 : index
      %c0_13 = arith.constant 0 : index
      %24 = vector.load %arg4[%c0_12, %c0_13] : memref<8x128xf32, #tpu.memory_space<vmem>>, vector<8x128xf32>
      tpu.vector_store %arg4[%c0_12, %c0_13], %23 {strides = array<i32>} : memref<8x128xf32, #tpu.memory_space<vmem>>, vector<8x128xf32>,
    } else {
    }
    return
  }
  func.func @transform_0(%arg0: i32, %arg1: i32) -> (i32, i32) {
    %c1_i32 = arith.constant 1 : i32
    %0 = arith.muli %arg0, %c1_i32 : i32
    %1 = arith.addi %0, %arg1 : i32
    %c0_i32 = arith.constant 0 : i32
    %2 = arith.minsi %1, %c0_i32 : i32
    %c0_i32_0 = arith.constant 0 : i32
    %c0_i32_1 = arith.constant 0 : i32
    return %2, %c0_i32_0 : i32, i32
  }
  func.func @transform_1(%arg0: i32, %arg1: i32) -> (i32, i32) {
    %c1_i32 = arith.constant 1 : i32
    %0 = arith.muli %arg0, %c1_i32 : i32
    %1 = arith.addi %0, %arg1 : i32
    %c0_i32 = arith.constant 0 : i32
    %2 = arith.minsi %1, %c0_i32 : i32
    %c0_i32_0 = arith.constant 0 : i32
    %c0_i32_1 = arith.constant 0 : i32
    return %2, %c0_i32_0 : i32, i32
  }
  func.func @transform_2(%arg0: i32, %arg1: i32) -> (i32, i32) {
    %c0_i32 = arith.constant 0 : i32
    %c0_i32_0 = arith.constant 0 : i32
    return %arg0, %c0_i32 : i32, i32
  }
}

</mosaic_0001>

<bundles_post_ra>
// kernel: tpu_custom_call.1
= control target key start
LH: loop header
LB: loop body
LE: loop exit
PB: predicated region body
PF: predicated region fallthrough
CT: control target
= control target key end

     0   :  { %7 = vsyncpa [#allocation4], 0  ;;  %s247_s0 = inlined_call_operand.hbm [shape: f32[16,128], index: 0, kind: input, shape index: {}]   ;;  %s248_s1 = inlined_call_operand.hbm [shape: f32[16,128], index: 1, kind: input, shape index: {}]   ;;  %s249_s2 = inlined_call_operand.hbm [shape: f32[8,128], index: 2, kind: output, shape index: {}]  }
   0x1   :  { %8 = vsyncpa [#allocation7], 0 }
   0x2   :  { %9 = vsyncpa [#allocation5], 0  ;;  %s218_s9 = smov [#allocation3]  }
   0x3   :  { %s21_s10 = sshll.u32 %s218_s9, 4  ;;  %s22_s10 = int_to_ptr.vmem [resolvable:$true] %s21_s10 }
   0x4   :  { %s160_s11 = scalar_lea.vmem %s22_s10, 256  ;;  %p165_p1 = scmp.lt.s32.totalorder %s22_s10, %s22_s10 }
   0x5   :  { %p161_p0 = scmp.ne.s32.totalorder %s22_s10, %s160_s11  ;;  %p166_p2 = scmp.lt.s32.totalorder %s160_s11, %s160_s11 }
   0x7   :  { %p167_p3 = por %p166_p2, %p165_p1 }
   0x9   :  { %p168_p4 = pnand %p167_p3, %p161_p0 }
   0xb   :  { %171 = shalt.err (!%p168_p4)
}
   0xc   :  { %s219_s12 = smov 128   ;;  %s220_s13 = smov 8  }
   0xd   :  { %27 = dma.hbm_to_vmem [thread:$0]  %s247_s0, 256, %s22_s10, [#allocation4], %s219_s12, %s219_s12, %s220_s13  }
   0xe   :  { %s221_s16 = smov [#allocation6]  }
   0xf   :  { %s39_s17 = sshll.u32 %s221_s16, 4  ;;  %s40_s17 = int_to_ptr.vmem [resolvable:$true] %s39_s17 }
  0x10   :  { %s180_s18 = scalar_lea.vmem %s40_s17, 256  ;;  %p185_p6 = scmp.lt.s32.totalorder %s40_s17, %s40_s17 }
  0x11   :  { %p181_p5 = scmp.ne.s32.totalorder %s40_s17, %s180_s18  ;;  %p186_p7 = scmp.lt.s32.totalorder %s180_s18, %s180_s18 }
  0x13   :  { %p187_p8 = por %p186_p7, %p185_p6 }
  0x15   :  { %p188_p9 = pnand %p187_p8, %p181_p5 }
  0x17   :  { %191 = shalt.err (!%p188_p9)
}
  0x18   :  { %45 = dma.hbm_to_vmem [thread:$0]  %s248_s1, 256, %s40_s17, [#allocation7], %s219_s12, %s219_s12, %s220_s13  }
  0x19   :  { %212 = dma.done.wait [#allocation4], 256  }
  0x1a   :  { %213 = vsyncadd [#allocation4], 4294967040 }
  0x1b   :  { %214 = dma.done.wait [#allocation7], 256  }
  0x1c   :  { %215 = vsyncadd [#allocation7], 4294967040  ;;  %v65_v0 = vld [vmem:[#allocation3] sm:$0xff]  ;;  %v66_v1 = vld [vmem:[#allocation3 + $0x8] sm:$0xff]  ;;  %s222_s0 = smov [#allocation8]  }
  0x1d   :  { %v67_v2 = vld [vmem:[#allocation6] sm:$0xff]  ;;  %v68_v3 = vld [vmem:[#allocation6 + $0x8] sm:$0xff]  ;;  %s129_s1 = sshll.u32 %s222_s0, 4  ;;  %s130_s1 = int_to_ptr.vmem [resolvable:$true] %s129_s1 }
  0x1e   :  { %v69_v4 = vsub.f32 %v65_v0, %v67_v2  ;;  %v70_v5 = vsub.f32 %v66_v1, %v68_v3  ;;  %s192_s21 = scalar_lea.vmem %s130_s1, 128  ;;  %p197_p11 = scmp.lt.s32.totalorder %s130_s1, %s130_s1 }
  0x1f   :  { %p193_p10 = scmp.ne.s32.totalorder %s130_s1, %s192_s21  ;;  %p198_p12 = scmp.lt.s32.totalorder %s192_s21, %s192_s21 }
  0x20   :  { %v71_v6 = vmul.f32 %v69_v4, %v69_v4  ;;  %v72_v7 = vmul.f32 %v70_v5, %v70_v5 }
  0x21   :  { %p199_p13 = por %p198_p12, %p197_p11 }
  0x22   :  { %v73_v8 = vadd.f32 1e-06, %v71_v6  ;;  %v74_v9 = vadd.f32 1e-06, %v72_v7 }
  0x23   :  { %p200_p0 = pnand %p199_p13, %p193_p10 }
  0x24   :  { %148 = vrsqrt.f32 %v73_v8  ;;  %vm77_vm0 = vcmp.eq.f32.partialorder %v73_v8, inf  ;;  %v80_v11 = vand.u32 2147483648, %v73_v8  ;;  %vm79_vm1 = vcmp.eq.f32.partialorder %v73_v8, 0.0 }
  0x25   :  { %150 = vrsqrt.f32 %v74_v9  ;;  %vm84_vm2 = vcmp.eq.f32.partialorder %v74_v9, inf  ;;  %v87_v14 = vand.u32 2147483648, %v74_v9  ;;  %vm86_vm3 = vcmp.eq.f32.partialorder %v74_v9, 0.0 }
  0x31   :  { %v149_v10 = vpop.eup %148 }
  0x32   :  { %v151_v12 = vpop.eup %150  ;;  %v76_v13 = vmul.f32 %v149_v10, %v73_v8 }
  0x33   :  { %v83_v15 = vmul.f32 %v151_v12, %v74_v9 }
  0x34   :  { %v78_v16 = vsel %vm77_vm0, %v73_v8, %v76_v13 }
  0x35   :  { %v81_v17 = vsel %vm79_vm1, %v80_v11, %v78_v16  ;;  %v85_v18 = vsel %vm84_vm2, %v74_v9, %v83_v15 }
  0x36   :  { %v88_v19 = vsel %vm86_vm3, %v87_v14, %v85_v18 }
  0x37   :  { %v97_v20 = vadd.f32 %v88_v19, %v81_v17 }
  0x39   :  { %122 = vst [vmem:[#allocation8] sm:$0xff] %v97_v20 }
  0x3a   :  { %203 = shalt.err (!%p200_p0)
}
  0x3b   :  { %132 = dma.vmem_to_hbm [thread:$0]  %s130_s1, 128, %s249_s2, [#allocation5]  }
  0x3c   :  { %216 = dma.done.wait [#allocation5], 128  }
  0x3d   :  { %217 = vsyncadd [#allocation5], 4294967168 }
  0x3e   :  { %136 = vsyncpa [#allocation4], 1 }
  0x3f   :  { %137 = vsyncpa [#allocation7], 1 }
  0x40   :  { %138 = vsyncpa [#allocation5], 1 }

</bundles_post_ra>
